<compile_context>
chip_gen: v7x
topology: tpu7x:2x2x1
jax: 0.10.0
libtpu: 0.0.40
codegen_flags: <defaults>
</compile_context>

<pallas_src>
import math
import jax
import jax.numpy as jnp
from jax.experimental import pallas as pl
from jax.experimental.pallas import tpu as pltpu

LANE = 128


def _round_up(n, m):
    return ((n + m - 1) // m) * m


def gateb_kernel(x_ref, w_ref, b_ref, o_ref):
    """One batch tile of the folded GateB affine map.

    x_ref : (tb, D)      f32   (cast to bf16 in-kernel; no extra XLA pass)
    w_ref : (D, out_pad) bf16  (VMEM-resident, constant index_map)
    b_ref : (1, out_pad) f32
    o_ref : (tb, out_pad) bf16 (lane-dense, unmasked stores)
    """
    x = x_ref[...].astype(jnp.bfloat16)
    out = jnp.dot(x, w_ref[...], preferred_element_type=jnp.float32) + b_ref[...]
    o_ref[...] = out.astype(o_ref.dtype)


def gateb_forward(x, params, *, tb=None):
    B, D = x.shape
    out_size = int(params["out_size"])
    w_eff = params["w_eff"]          # (D, out_pad) bf16
    b_eff = params["b_eff"]          # (1, out_pad) f32
    out_pad = w_eff.shape[1]
    assert w_eff.shape[0] == D

    # Batch tile: multiple of 16 (bf16 sublane packing).  Small batches run in
    # a single grid step; large batches get 256-row tiles (feeds the 256-wide
    # MXU M dimension on v6e/v7x and both v7x cores via the parallel axis).
    if tb is None:
        tb = min(256, _round_up(max(B, 1), 16))
    grid = (pl.cdiv(B, tb),)

    flops = 2 * B * D * out_pad
    bytes_accessed = (B * D * x.dtype.itemsize          # x read
                      + D * out_pad * 2                 # bf16 weight
                      + out_pad * 4                     # f32 bias
                      + B * out_pad * 2)                # bf16 output

    out = pl.pallas_call(
        gateb_kernel,
        out_shape=jax.ShapeDtypeStruct((B, out_pad), jnp.bfloat16),
        grid=grid,
        in_specs=[
            pl.BlockSpec((tb, D), lambda i: (i, 0)),           # batch-tiled x
            pl.BlockSpec(w_eff.shape, lambda i: (0, 0)),       # resident weight
            pl.BlockSpec(b_eff.shape, lambda i: (0, 0)),       # resident bias
        ],
        out_specs=pl.BlockSpec((tb, out_pad), lambda i: (i, 0)),
        compiler_params=pltpu.CompilerParams(
            dimension_semantics=("parallel",)),
        cost_estimate=pl.CostEstimate(
            flops=int(flops), transcendentals=0,
            bytes_accessed=int(bytes_accessed)),
    )(x, w_eff, b_eff)

    # Drop padded lanes and return the canonical f32 output of the module.
    return out[:, :out_size].astype(jnp.float32)


def init_params(key, input_size, output_size):
    """f32 master params (PyTorch Linear init) + folded bf16 kernel params."""
    D = input_size
    Dh = D // 2
    out_pad = _round_up(output_size, LANE)
    ks = jax.random.split(key, 16)

    def lin(kw, kb, fan_in, fan_out):
        bound = 1.0 / math.sqrt(fan_in)
        w = jax.random.uniform(kw, (fan_in, fan_out), jnp.float32, -bound, bound)
        b = jax.random.uniform(kb, (1, fan_out), jnp.float32, -bound, bound)
        return w, b

    p = {"out_size": output_size}
    p["wq1"], p["bq1"] = lin(ks[0], ks[1], D, D)       # reference-only (softmax==1)
    p["wk1"], p["bk1"] = lin(ks[2], ks[3], D, D)       # reference-only
    p["wv1"], p["bv1"] = lin(ks[4], ks[5], D, D)
    p["w1"],  p["b1"]  = lin(ks[6], ks[7], D, Dh)
    p["wq2"], p["bq2"] = lin(ks[8], ks[9], Dh, Dh)     # reference-only
    p["wk2"], p["bk2"] = lin(ks[10], ks[11], Dh, Dh)   # reference-only
    p["wv2"], p["bv2"] = lin(ks[12], ks[13], Dh, Dh)
    p["w2"],  p["b2"]  = lin(ks[14], ks[15], Dh, output_size)

    # Fold the fully-affine network once, in f32:
    #   out = (((x@Wv1+bv1)@W1+b1)@Wv2+bv2)@W2+b2  ==  x @ W_eff + b_eff
    w_eff = p["wv1"] @ p["w1"] @ p["wv2"] @ p["w2"]                         # (D, out)
    b_eff = ((p["bv1"] @ p["w1"] + p["b1"]) @ p["wv2"] + p["bv2"]) @ p["w2"] + p["b2"]

    # Lane-pad to 128 for unmasked output stores; bf16 weight, f32 bias.
    w_eff_p = jnp.zeros((D, out_pad), jnp.float32).at[:, :output_size].set(w_eff)
    b_eff_p = jnp.zeros((1, out_pad), jnp.float32).at[:, :output_size].set(b_eff)
    p["w_eff"] = w_eff_p.astype(jnp.bfloat16)
    p["b_eff"] = b_eff_p
    return p


def gateb_reference(x, p):
    """Canonical f32 reference with the FULL original GateB semantics
    (q/k/v projections + softmax over the length-1 sequence)."""
    D = x.shape[-1]
    Dh = D // 2

    def attn(h, wq, bq, wk, bk, wv, bv, dim):
        q = h @ wq + bq
        k = h @ wk + bk
        v = h @ wv + bv
        s = jnp.sum(q * k, axis=-1, keepdims=True) / math.sqrt(dim)  # (B, 1)
        a = jax.nn.softmax(s, axis=-1)                               # length-1 -> 1.0
        return a * v

    att1 = attn(x, p["wq1"], p["bq1"], p["wk1"], p["bk1"], p["wv1"], p["bv1"], D)
    h = att1 @ p["w1"] + p["b1"]
    att2 = attn(h, p["wq2"], p["bq2"], p["wk2"], p["bk2"], p["wv2"], p["bv2"], Dh)
    return att2 @ p["w2"] + p["b2"]


if __name__ == "__main__":
    # Small shapes consistent with the module: batch=16, input_size=256, output_size=1.
    B, INPUT_SIZE, OUTPUT_SIZE = 16, 256, 1
    key = jax.random.PRNGKey(0)
    kx, kp = jax.random.split(key)
    x = jax.random.normal(kx, (B, INPUT_SIZE), jnp.float32)
    params = init_params(kp, INPUT_SIZE, OUTPUT_SIZE)

    out = gateb_forward(x, params)
    out = jax.block_until_ready(out)

    ref = gateb_reference(x, params)
    assert out.shape == (B, OUTPUT_SIZE), out.shape
    # bf16 kernel (x, W_eff, output all bf16-quantized once) vs full f32 chain.
    assert jnp.allclose(out, ref, atol=1e-2, rtol=1e-2), \
        float(jnp.max(jnp.abs(out - ref)))
    print("KERNEL_OK")
</pallas_src>

<mosaic_0001>
module attributes {stable_mosaic.version = 11 : i64} {
  func.func @gateb_kernel(%arg0: i32, %arg1: memref<16x256xf32, #tpu.memory_space<vmem>>, %arg2: memref<256x128xbf16, #tpu.memory_space<vmem>>, %arg3: memref<1x128xf32, #tpu.memory_space<vmem>>, %arg4: memref<16x128xbf16, #tpu.memory_space<vmem>>) attributes {dimension_semantics = [#tpu.dimension_semantics<parallel>], iteration_bounds = array<i64: 1>, scalar_prefetch = 0 : i64, scratch_operands = 0 : i64, tpu.core_type = #tpu.core_type<tc>, window_params = [{transform_indices = @transform_0, window_bounds = array<i64: 16, 256>}, {pipeline_mode = #tpu.pipeline_mode<synchronous>, transform_indices = @transform_1, window_bounds = array<i64: 256, 128>}, {pipeline_mode = #tpu.pipeline_mode<synchronous>, transform_indices = @transform_2, window_bounds = array<i64: 1, 128>}, {transform_indices = @transform_3, window_bounds = array<i64: 16, 128>}]} {
    %c0 = arith.constant 0 : index
    %c0_0 = arith.constant 0 : index
    %0 = vector.load %arg1[%c0, %c0_0] : memref<16x256xf32, #tpu.memory_space<vmem>>, vector<16x256xf32>
    %1 = arith.truncf %0 : vector<16x256xf32> to vector<16x256xbf16>
    %c0_1 = arith.constant 0 : index
    %c0_2 = arith.constant 0 : index
    %2 = vector.load %arg2[%c0_1, %c0_2] : memref<256x128xbf16, #tpu.memory_space<vmem>>, vector<256x128xbf16>
    %cst = arith.constant dense<0.000000e+00> : vector<16x128xf32>
    %3 = tpu.matmul %1, %2, %cst {dimension_numbers = #tpu.dot_dimension_numbers<[1], [0], [0], [1], [0, 0, 1, 1], [], []>} : vector<16x256xbf16>, vector<256x128xbf16>, vector<16x128xf32> -> vector<16x128xf32>
    %c0_3 = arith.constant 0 : index
    %c0_4 = arith.constant 0 : index
    %4 = vector.load %arg3[%c0_3, %c0_4] : memref<1x128xf32, #tpu.memory_space<vmem>>, vector<1x128xf32>
    %5 = vector.broadcast %4 : vector<1x128xf32> to vector<16x128xf32>
    %6 = arith.addf %3, %5 : vector<16x128xf32>
    %7 = arith.truncf %6 : vector<16x128xf32> to vector<16x128xbf16>
    %c0_5 = arith.constant 0 : index
    %c0_6 = arith.constant 0 : index
    %8 = vector.load %arg4[%c0_5, %c0_6] : memref<16x128xbf16, #tpu.memory_space<vmem>>, vector<16x128xbf16>
    tpu.vector_store %arg4[%c0_5, %c0_6], %7 {strides = array<i32>} : memref<16x128xbf16, #tpu.memory_space<vmem>>, vector<16x128xbf16>,
    return
  }
  func.func @transform_0(%arg0: i32) -> (i32, i32) {
    %c0_i32 = arith.constant 0 : i32
    %c0_i32_0 = arith.constant 0 : i32
    return %arg0, %c0_i32 : i32, i32
  }
  func.func @transform_1(%arg0: i32) -> (i32, i32) {
    %c0_i32 = arith.constant 0 : i32
    %c0_i32_0 = arith.constant 0 : i32
    %c0_i32_1 = arith.constant 0 : i32
    return %c0_i32, %c0_i32_0 : i32, i32
  }
  func.func @transform_2(%arg0: i32) -> (i32, i32) {
    %c0_i32 = arith.constant 0 : i32
    %c0_i32_0 = arith.constant 0 : i32
    %c0_i32_1 = arith.constant 0 : i32
    return %c0_i32, %c0_i32_0 : i32, i32
  }
  func.func @transform_3(%arg0: i32) -> (i32, i32) {
    %c0_i32 = arith.constant 0 : i32
    %c0_i32_0 = arith.constant 0 : i32
    return %arg0, %c0_i32 : i32, i32
  }
}

</mosaic_0001>

<bundles_post_ra>
// kernel: tpu_custom_call.1
= control target key start
LH: loop header
LB: loop body
LE: loop exit
PB: predicated region body
PF: predicated region fallthrough
CT: control target
= control target key end

     0   :  { %8 = vsyncpa [#allocation3], 0  ;;  %s469_s0 = inlined_call_operand.hbm [shape: f32[16,256], index: 0, kind: input, shape index: {}]   ;;  %s470_s1 = inlined_call_operand.hbm [shape: bf16[256,128], index: 1, kind: input, shape index: {}]   ;;  %s471_s2 = inlined_call_operand.vmem [shape: f32[1,128], index: 2, kind: input, shape index: {}]   ;;  %s472_s3 = inlined_call_operand.hbm [shape: bf16[16,128], index: 3, kind: output, shape index: {}]  }
   0x1   :  { %9 = vsyncpa [#allocation6], 0 }
   0x2   :  { %10 = vsyncpa [#allocation4], 0  ;;  %s397_s12 = smov [#allocation2]   ;;  %s325_s16 = scalar_lea.hbm %s469_s0, 512 }
   0x3   :  { %s16_s13 = sshll.u32 %s397_s12, 4  ;;  %p326_p0 = scmp.ne.s32.totalorder %s469_s0, %s325_s16  ;;  %s17_s13 = int_to_ptr.vmem [resolvable:$true] %s16_s13 }
   0x4   :  { %p329_p1 = scmp.lt.u32.totalorder %s325_s16, %s469_s0 }
   0x6   :  { %p331_p2 = pnand %p329_p1, %p326_p0 }
   0x8   :  { %334 = shalt.err (!%p331_p2)
}
   0x9   :  { %s335_s21 = scalar_lea.vmem %s17_s13, 512  ;;  %p340_p4 = scmp.lt.s32.totalorder %s17_s13, %s17_s13 }
   0xa   :  { %p336_p3 = scmp.ne.s32.totalorder %s17_s13, %s335_s21  ;;  %p341_p5 = scmp.lt.s32.totalorder %s335_s21, %s335_s21 }
   0xc   :  { %p342_p6 = por %p341_p5, %p340_p4 }
   0xe   :  { %p343_p7 = pnand %p342_p6, %p336_p3 }
  0x10   :  { %346 = shalt.err (!%p343_p7)
}
  0x11   :  { %s398_s22 = smov 256   ;;  %s399_s23 = smov 16  }
  0x12   :  { %22 = dma.hbm_to_vmem [thread:$0]  %s469_s0, 512, %s17_s13, [#allocation3], %s398_s22, %s398_s22, %s399_s23  }
  0x13   :  { %s400_s26 = smov [#allocation5]   ;;  %s347_s30 = scalar_lea.hbm %s470_s1, 2048 }
  0x14   :  { %s28_s27 = sshll.u32 %s400_s26, 4  ;;  %p348_p8 = scmp.ne.s32.totalorder %s470_s1, %s347_s30  ;;  %s29_s27 = int_to_ptr.vmem [resolvable:$true] %s28_s27 }
  0x15   :  { %p351_p9 = scmp.lt.u32.totalorder %s347_s30, %s470_s1 }
  0x17   :  { %p353_p10 = pnand %p351_p9, %p348_p8 }
  0x19   :  { %356 = shalt.err (!%p353_p10)
}
  0x1a   :  { %s357_s8 = scalar_lea.vmem %s29_s27, 2048  ;;  %p362_p12 = scmp.lt.s32.totalorder %s29_s27, %s29_s27 }
  0x1b   :  { %p358_p11 = scmp.ne.s32.totalorder %s29_s27, %s357_s8  ;;  %p363_p13 = scmp.lt.s32.totalorder %s357_s8, %s357_s8 }
  0x1d   :  { %p364_p0 = por %p363_p13, %p362_p12 }
  0x1f   :  { %p365_p1 = pnand %p364_p0, %p358_p11 }
  0x21   :  { %368 = shalt.err (!%p365_p1)
}
  0x22   :  { %s401_s0 = smov 64   ;;  %s402_s9 = smov 4  }
  0x23   :  { %34 = dma.hbm_to_vmem [thread:$0]  %s470_s1, 2048, %s29_s27, [#allocation6], %s401_s0, %s401_s0, %s402_s9  }
  0x24   :  { %391 = dma.done.wait [#allocation3], 512  }
  0x25   :  { %392 = vsyncadd [#allocation3], 4294966784 }
  0x26   :  { %393 = dma.done.wait [#allocation6], 2048  }
  0x27   :  { %394 = vsyncadd [#allocation6], 4294965248  ;;  %v309_v0 = vld [vmem:[#allocation5 + $0x40] sm:$0xff]   ;;  %v311_v2 = vld [vmem:[#allocation5 + $0x48] sm:$0xff]   ;;  %s403_s13 = smov [#allocation7]  }
  0x28   :  { %v310_v1 = vld [vmem:[#allocation5] sm:$0xff]   ;;  %280 = vmatprep.subr.bf16.mxu0 %v309_v0  ;;  %v312_v3 = vld [vmem:[#allocation5 + $0x8] sm:$0xff]   ;;  %v313_v4 = vld [vmem:[#allocation5 + $0x50] sm:$0xff]   ;;  %s241_s14 = sshll.u32 %s403_s13, 4  ;;  %s242_s14 = int_to_ptr.vmem [resolvable:$true] %s241_s14 }
  0x29   :  { %281 = vmatpush3.bf16.msra.mxu0 %v310_v1  ;;  %v314_v5 = vld [vmem:[#allocation5 + $0x10] sm:$0xff]   ;;  %v315_v6 = vld [vmem:[#allocation5 + $0x58] sm:$0xff]   ;;  %v317_v8 = vld [vmem:[#allocation5 + $0x60] sm:$0xff]   ;;  %s369_s15 = scalar_lea.vmem %s242_s14, 128  ;;  %p374_p3 = scmp.lt.s32.totalorder %s242_s14, %s242_s14 }
  0x2a   :  { %282 = vmatprep.subr.bf16.mxu0 %v311_v2  ;;  %v316_v7 = vld [vmem:[#allocation5 + $0x18] sm:$0xff]   ;;  %v318_v9 = vld [vmem:[#allocation5 + $0x20] sm:$0xff]   ;;  %v319_v10 = vld [vmem:[#allocation5 + $0x68] sm:$0xff]   ;;  %p370_p2 = scmp.ne.s32.totalorder %s242_s14, %s369_s15  ;;  %p375_p4 = scmp.lt.s32.totalorder %s369_s15, %s369_s15 }
  0x2b   :  { %v45_v11 = vld [vmem:[#allocation2 + $0x8] sm:$0xff]  ;;  %v47_v12 = vld [vmem:[#allocation2 + $0x18] sm:$0xff]  ;;  %v321_v15 = vld [vmem:[#allocation5 + $0x70] sm:$0xff]  }
  0x2c   :  { %v49_v13 = vpack.c.bf16 %v47_v12, %v45_v11  ;;  %v320_v14 = vld [vmem:[#allocation5 + $0x28] sm:$0xff]   ;;  %v322_v16 = vld [vmem:[#allocation5 + $0x30] sm:$0xff]   ;;  %v323_v17 = vld [vmem:[#allocation5 + $0x78] sm:$0xff]   ;;  %p376_p5 = por %p375_p4, %p374_p3 }
  0x2d   :  { %283 = vmatpush3.bf16.msra.mxu0 %v312_v3  ;;  %v324_v18 = vld [vmem:[#allocation5 + $0x38] sm:$0xff]   ;;  %v44_v19 = vld [vmem:[#allocation2] sm:$0xff]  ;;  %v46_v20 = vld [vmem:[#allocation2 + $0x10] sm:$0xff] }
  0x2e   :  { %284 = vmatprep.subr.bf16.mxu0 %v313_v4  ;;  %217 = vmatprep.mubr.bf16.mxu0 %v49_v13  ;;  %v48_v21 = vpack.c.bf16 %v46_v20, %v44_v19  ;;  %v254_v26 = vld [vmem:[%s471_s2] ss:$0 sm:$0xff]  ;;  %p377_p6 = pnand %p376_p5, %p370_p2 }
  0x31   :  { %285 = vmatpush3.bf16.msra.mxu0 %v314_v5 }
  0x32   :  { %286 = vmatprep.subr.bf16.mxu0 %v315_v6 }
  0x35   :  { %287 = vmatpush3.bf16.msra.mxu0 %v316_v7 }
  0x36   :  { %288 = vmatprep.subr.bf16.mxu0 %v317_v8 }
  0x39   :  { %289 = vmatpush3.bf16.msra.mxu0 %v318_v9 }
  0x3a   :  { %290 = vmatprep.subr.bf16.mxu0 %v319_v10 }
  0x3d   :  { %291 = vmatpush3.bf16.msra.mxu0 %v320_v14 }
  0x3e   :  { %292 = vmatprep.subr.bf16.mxu0 %v321_v15 }
  0x41   :  { %293 = vmatpush3.bf16.msra.mxu0 %v322_v16 }
  0x42   :  { %294 = vmatprep.subr.bf16.mxu0 %v323_v17 }
  0x45   :  { %295 = vmatpush3.bf16.msra.mxu0 %v324_v18 }
  0x48   :  { %218 = vmatmul.mubr.bf16.vlgmr.msra.gmra.mrb[0].mxu0 %v48_v21 }
 0x11b   :  { %v296_v22 = vpop.f32.mrb[0].mxu0 }
 0x11c   :  { %v297_v23 = vpop.f32.mrb[1].mxu0 }
 0x11d   :  { %v298_v24 = vadd.f32 %v297_v23, %v296_v22  ;;  %v299_v25 = vpop.f32.mrb[2].mxu0 }
 0x11e   :  { %v300_v27 = vpop.f32.mrb[3].mxu0 }
 0x11f   :  { %v301_v28 = vadd.f32 %v300_v27, %v299_v25  ;;  %v220_v29 = vadd.f32 %v298_v24, %v254_v26 }
 0x121   :  { %v223_v30 = vadd.f32 %v301_v28, %v254_v26 }
 0x123   :  { %v278_v31 = vpack.c.bf16 %v223_v30, %v220_v29 }
 0x125   :  { %279 = vst [vmem:[#allocation7] sm:$0xff] %v278_v31  }
 0x126   :  { %380 = shalt.err (!%p377_p6)
}
 0x127   :  { %s381_s2 = scalar_lea.hbm %s472_s3, 128 }
 0x128   :  { %p382_p7 = scmp.ne.s32.totalorder %s472_s3, %s381_s2  ;;  %p385_p8 = scmp.lt.u32.totalorder %s381_s2, %s472_s3 }
 0x12a   :  { %p387_p9 = pnand %p385_p8, %p382_p7 }
 0x12c   :  { %390 = shalt.err (!%p387_p9)
}
 0x12d   :  { %247 = dma.vmem_to_hbm [thread:$0]  %s242_s14, 128, %s472_s3, [#allocation4], %s401_s0, %s401_s0, %s402_s9  }
 0x12e   :  { %395 = dma.done.wait [#allocation4], 128  }
 0x12f   :  { %396 = vsyncadd [#allocation4], 4294967168 }
 0x130   :  { %251 = vsyncpa [#allocation3], 1 }
 0x131   :  { %252 = vsyncpa [#allocation6], 1 }
 0x132   :  { %253 = vsyncpa [#allocation4], 1 }

</bundles_post_ra>
